<compile_context>
chip_gen: v6e
topology: v6e:2x2x1
jax: 0.10.0
libtpu: 0.0.40
codegen_flags: <defaults>
</compile_context>

<pallas_src>
import jax
import jax.numpy as jnp
from jax.experimental import pallas as pl
from jax.experimental.pallas import tpu as pltpu


def _round_up(x, m):
    return ((x + m - 1) // m) * m


# --------------------------------------------------------------------------- #
# Stage 1: W_eff = sum_m w_m * W_m                                             #
# --------------------------------------------------------------------------- #
def _combine_kernel(w_ref, W_ref, weff_ref):
    # grid = (D-tiles, C-tiles, M); M is the innermost sequential reduction axis.
    m = pl.program_id(2)
    wW = w_ref[m] * W_ref[...].astype(jnp.float32)   # VPU only; W_ref is (block_d, block_c)

    @pl.when(m == 0)
    def _():                      # assign the first term: no zero-init pass
        weff_ref[...] = wW

    @pl.when(m != 0)
    def _():
        weff_ref[...] += wW


# --------------------------------------------------------------------------- #
# Stage 2: out = x @ W_eff + b_eff  (standard tiled matmul, single MXU path)   #
# --------------------------------------------------------------------------- #
def _matmul_bias_kernel(x_ref, w_ref, b_ref, o_ref, acc_ref):
    k = pl.program_id(2)
    part = jnp.dot(x_ref[...], w_ref[...].astype(x_ref.dtype),
                   preferred_element_type=jnp.float32)

    @pl.when(k == 0)
    def _():
        acc_ref[...] = part

    @pl.when(k != 0)
    def _():
        acc_ref[...] += part

    @pl.when(k == pl.num_programs(2) - 1)
    def _():
        o_ref[...] = (acc_ref[...] + b_ref[...]).astype(o_ref.dtype)


def model_ensemble(x, W, b, weights=None, *, block_b=None, block_c=None, block_d=None):
    """x: (B, D), W: (M, D, C), b: (M, C), weights: (M,) or None -> (B, C)."""
    B, D = x.shape
    M, D2, C = W.shape
    assert D2 == D and b.shape == (M, C)
    if weights is None:                                   # PyTorch default: ones(M) / M
        weights = jnp.ones((M,), jnp.float32) / M
    weights = weights.astype(jnp.float32)
    assert weights.shape == (M,)
    f32 = jnp.float32

    # ---- tile sizes (MXU-aligned, lane-dense output) ----
    C_pad = _round_up(C, 128)                              # lane-dense stores (>=128)
    if block_c is None:
        block_c = 256 if (C_pad % 256 == 0) else 128
    block_c = min(block_c, C_pad)

    if block_d is None:
        block_d = D if D <= 1024 else 512
    if block_d < D:
        block_d = _round_up(block_d, 128)                  # lane dim of the x tile
        D_pad = _round_up(D, block_d)
    else:
        block_d = D
        D_pad = D

    if block_b is None:
        if B >= 512:
            block_b = 256
        elif B > 16 and (C_pad // block_c) < 2:
            # v7x megacore: ensure the "parallel" axes have >= 2 tiles.
            block_b = _round_up(pl.cdiv(B, 2), 8)
        else:
            block_b = _round_up(B, 8)
    B_pad = _round_up(B, block_b)

    nb, nc, nd = B_pad // block_b, C_pad // block_c, D_pad // block_d

    # ---- wrapper-side zero padding (does not change the sliced result) ----
    x_p = x if (B_pad == B and D_pad == D) else jnp.pad(x, ((0, B_pad - B), (0, D_pad - D)))
    W_p = W if (D_pad == D and C_pad == C) else jnp.pad(W, ((0, 0), (0, D_pad - D), (0, C_pad - C)))

    # Hoisted bias combine (tiny: M*C elements) — folded out of both kernels.
    b_eff = jnp.einsum("m,mc->c", weights, b.astype(f32))
    b_eff = jnp.pad(b_eff, (0, C_pad - C)).reshape(1, C_pad)

    cparams = pltpu.CompilerParams(
        dimension_semantics=("parallel", "parallel", "arbitrary"),
        vmem_limit_bytes=40 * 1024 * 1024,                 # safe headroom on v7x's 64 MiB
    )

    # ---- Stage 1: W_eff = sum_m w_m * W_m (W streamed from HBM exactly once) ----
    w_eff = pl.pallas_call(
        _combine_kernel,
        out_shape=jax.ShapeDtypeStruct((D_pad, C_pad), f32),
        grid_spec=pltpu.PrefetchScalarGridSpec(
            num_scalar_prefetch=1,                         # ensemble weights -> SMEM
            grid=(nd, nc, M),
            in_specs=[
                pl.BlockSpec((None, block_d, block_c),
                             lambda di, ci, m, w: (m, di, ci)),
            ],
            out_specs=pl.BlockSpec((block_d, block_c),
                                   lambda di, ci, m, w: (di, ci)),
        ),
        compiler_params=cparams,
    )(weights, W_p)

    # ---- Stage 2: out = x @ W_eff + b_eff ----
    out_p = pl.pallas_call(
        _matmul_bias_kernel,
        out_shape=jax.ShapeDtypeStruct((B_pad, C_pad), x.dtype),
        grid_spec=pltpu.PrefetchScalarGridSpec(
            num_scalar_prefetch=0,
            grid=(nb, nc, nd),
            in_specs=[
                pl.BlockSpec((block_b, block_d), lambda bi, ci, ki: (bi, ki)),
                pl.BlockSpec((block_d, block_c), lambda bi, ci, ki: (ki, ci)),
                pl.BlockSpec((1, block_c),       lambda bi, ci, ki: (0, ci)),
            ],
            out_specs=pl.BlockSpec((block_b, block_c), lambda bi, ci, ki: (bi, ci)),
            scratch_shapes=[pltpu.VMEM((block_b, block_c), f32)],
        ),
        compiler_params=cparams,
    )(x_p, w_eff, b_eff)

    return out_p[:B, :C]


if __name__ == "__main__":
    key = jax.random.PRNGKey(0)
    k_x, k_w, k_b = jax.random.split(key, 3)

    M, B, D, C = 3, 8, 32, 16      # 3 ensembled linear heads

    # Dyadic-valued inputs (exactly representable in bf16) keep the kernel-vs-reference
    # check robust regardless of how the MXU handles f32 operands.
    x = jnp.round(jax.random.normal(k_x, (B, D)) * 4.0).astype(jnp.float32) / 4.0
    W = jnp.round(jax.random.normal(k_w, (M, D, C)) * 4.0).astype(jnp.float32) / 8.0
    b = jnp.round(jax.random.normal(k_b, (M, C)) * 4.0).astype(jnp.float32) / 8.0
    weights = jnp.array([0.25, 0.5, 0.25], dtype=jnp.float32)   # explicit ensemble weights

    out = jax.block_until_ready(model_ensemble(x, W, b, weights))

    # Pure-JAX reference: the literal ensemble (weighted sum of per-model predictions).
    preds = jnp.einsum("bd,mdc->mbc", x, W) + b[:, None, :]
    ref = jnp.sum(preds * weights[:, None, None], axis=0)

    assert out.shape == (B, C)
    assert jnp.allclose(out, ref, atol=1e-4, rtol=1e-4), float(jnp.max(jnp.abs(out - ref)))

    print("KERNEL_OK")
</pallas_src>

<mosaic_0001>
module attributes {stable_mosaic.version = 11 : i64} {
  func.func @_combine_kernel(%arg0: i32, %arg1: i32, %arg2: i32, %arg3: memref<3xf32, #tpu.memory_space<smem>>, %arg4: memref<1x32x128xf32, #tpu.memory_space<vmem>>, %arg5: memref<32x128xf32, #tpu.memory_space<vmem>>) attributes {dimension_semantics = [#tpu.dimension_semantics<parallel>, #tpu.dimension_semantics<parallel>, #tpu.dimension_semantics<arbitrary>], iteration_bounds = array<i64: 1, 1, 3>, scalar_prefetch = 1 : i64, scratch_operands = 0 : i64, tpu.core_type = #tpu.core_type<tc>, window_params = [{transform_indices = @transform_0, window_bounds = array<i64: 1, 32, 128>}, {transform_indices = @transform_1, window_bounds = array<i64: 32, 128>}]} {
    %0 = arith.index_cast %arg2 : i32 to index
    %1 = memref.load %arg3[%0] : memref<3xf32, #tpu.memory_space<smem>>
    %c0 = arith.constant 0 : index
    %c0_0 = arith.constant 0 : index
    %c0_1 = arith.constant 0 : index
    %2 = vector.load %arg4[%c0, %c0_0, %c0_1] : memref<1x32x128xf32, #tpu.memory_space<vmem>>, vector<1x32x128xf32>
    %3 = vector.shape_cast %2 : vector<1x32x128xf32> to vector<32x128xf32>
    %4 = vector.broadcast %1 : f32 to vector<32x128xf32>
    %5 = arith.mulf %4, %3 : vector<32x128xf32>
    %c0_i32 = arith.constant 0 : i32
    %6 = arith.cmpi eq, %arg2, %c0_i32 : i32
    %7 = arith.extui %6 : i1 to i32
    %c0_i32_2 = arith.constant 0 : i32
    %8 = arith.cmpi ne, %7, %c0_i32_2 : i32
    scf.if %8 {
      %c0_5 = arith.constant 0 : index
      %c0_6 = arith.constant 0 : index
      %12 = vector.load %arg5[%c0_5, %c0_6] : memref<32x128xf32, #tpu.memory_space<vmem>>, vector<32x128xf32>
      tpu.vector_store %arg5[%c0_5, %c0_6], %5 {strides = array<i32>} : memref<32x128xf32, #tpu.memory_space<vmem>>, vector<32x128xf32>,
    } else {
    }
    %c0_i32_3 = arith.constant 0 : i32
    %9 = arith.cmpi ne, %arg2, %c0_i32_3 : i32
    %10 = arith.extui %9 : i1 to i32
    %c0_i32_4 = arith.constant 0 : i32
    %11 = arith.cmpi ne, %10, %c0_i32_4 : i32
    scf.if %11 {
      %c0_5 = arith.constant 0 : index
      %c0_6 = arith.constant 0 : index
      %12 = vector.load %arg5[%c0_5, %c0_6] : memref<32x128xf32, #tpu.memory_space<vmem>>, vector<32x128xf32>
      %13 = arith.addf %12, %5 : vector<32x128xf32>
      %c0_7 = arith.constant 0 : index
      %c0_8 = arith.constant 0 : index
      %14 = vector.load %arg5[%c0_7, %c0_8] : memref<32x128xf32, #tpu.memory_space<vmem>>, vector<32x128xf32>
      tpu.vector_store %arg5[%c0_7, %c0_8], %13 {strides = array<i32>} : memref<32x128xf32, #tpu.memory_space<vmem>>, vector<32x128xf32>,
    } else {
    }
    return
  }
  func.func @transform_0(%arg0: i32, %arg1: i32, %arg2: i32, %arg3: memref<3xf32, #tpu.memory_space<smem>>) -> (i32, i32, i32) {
    %c0_i32 = arith.constant 0 : i32
    return %arg2, %arg0, %arg1 : i32, i32, i32
  }
  func.func @transform_1(%arg0: i32, %arg1: i32, %arg2: i32, %arg3: memref<3xf32, #tpu.memory_space<smem>>) -> (i32, i32) {
    %c0_i32 = arith.constant 0 : i32
    return %arg0, %arg1 : i32, i32
  }
}

</mosaic_0001>

<bundles_post_ra>
// kernel: tpu_custom_call.1
= control target key start
LH: loop header
LB: loop body
LE: loop exit
PB: predicated region body
PF: predicated region fallthrough
CT: control target
= control target key end

     0   :  { %s480_s9 = smov [#allocation3]   ;;  %s618_s0 = inlined_call_operand.hbm [shape: f32[3], index: 0, kind: input, shape index: {}]   ;;  %s619_s1 = inlined_call_operand.hbm [shape: f32[3,32,128], index: 1, kind: input, shape index: {}]   ;;  %s620_s2 = inlined_call_operand.hbm [shape: f32[32,128], index: 2, kind: output, shape index: {}]  }
   0x1   :  { %8 = dma.hbm_to_smem %s618_s0, 16, %s480_s9, [#allocation2] }
   0x2   :  { %446 = dma.done.wait [#allocation2], 16 }
   0x3   :  { %447 = vsyncadd [#allocation2], 4294967280 }
   0x4   :  { %10 = sfence }
   0x5   :  { %11 = vsyncpa [#allocation5], 0 }
   0x6   :  { %13 = vsyncpa [#allocation5 + $0x1], 0 }
   0x7   :  { %14 = vsyncpa [#allocation6], 0  ;;  %s505_s12 = smov 0   ;;  %s507_s13 = smov 0  }
   0x8   :  { %s509_s14 = smov 0   ;;  %s511_s15 = smov 0  }
   0x9   :  { %s513_s16 = smov 0   ;;  %s515_s17 = smov 0  }
   0xa LB: > { %s280_s0 = sadd.s32 4294967295, %s478_s17   ;;  %s32_s18 = sadd.s32 1, %s474_s16  ;;  %s478_s17 = sphi %s515_s17, %s20_s17   ;;  %s474_s16 = sphi %s513_s16, %s629_s16   ;;  %s470_s15 = sphi %s511_s15, %s628_s15   ;;  %s466_s14 = sphi %s509_s14, %s627_s14   ;;  %s462_s13 = sphi %s507_s13, %s626_s13   ;;  %s458_s12 = sphi %s505_s12, %s625_s12  }
   0xb   : > { %p33_p0 = scmp.ge.s32.totalorder %s32_s18, 3  ;;  %s50_s19 = sadd.s32 1, %s466_s14 }
   0xc   : > { %p57_p1 = scmp.ne.s32.totalorder %s466_s14, %s462_s13  ;;  %p58_p2 = scmp.eq.s32.totalorder %s478_s17, 0 }
   0xd   : > { %s631_s18 = smov (%p33_p0, %s32_s18), 0  ;;  %p63_p4 = scmp.ne.s32.totalorder %s462_s13, %s458_s12 }
   0xe   : > { %p541_p3 = por %p58_p2, %p57_p1  ;;  %s43_s21 = ssub.s32 %s474_s16, %s631_s18 }
   0xf   : > { %p64_p5 = scmp.eq.s32.totalorder %s280_s0, 0  ;;  %p48_p6 = scmp.eq.s32.totalorder %s43_s21, 0 }
  0x10   : > { %p305_p8 = scmp.lt.s32.totalorder %s478_s17, 3  ;;  %s115_s24 = sand.u32 1, %s466_s14  }
  0x11   : > { %p550_p7 = por %p64_p5, %p63_p4  ;;  %s294_s25 = sshll.u32 %s474_s16, 9 }
  0x12   : > { %s556_s23 = scalar_select %p48_p6, %s466_s14, %s50_s19  }
  0x13   : > { %s283_s26 = sshll.u32 %s115_s24, 5  ;;  %s128_s29 = scalar_lea.hbm %s619_s1, %s294_s25 }
  0x14   : > { %s119_s30 = scalar_lea.vmem [#allocation4], %s283_s26  ;;  %p565_p9 = pnand %p305_p8, %p541_p3 }
  0x15   : > { %s129_s3 = sshll.u32 %s119_s30, 4  ;;  %s116_s5 = scalar_lea.sflag [#allocation5], %s115_s24  ;;  %s130_s3 = int_to_ptr.vmem [resolvable:$true] %s129_s3 }
  0x16   : > { %p372_p10 = pneg %p565_p9  ;;  %s383_s6 = scalar_lea.vmem %s130_s3, 512 }
  0x17   : > { %p384_p11 = scmp.ne.s32.totalorder %s130_s3, %s383_s6  ;;  %s481_s7 = smov [#allocation4]  }
  0x18   : > { %s388_s8 = sshll.u32 %s481_s7, 4  ;;  %s389_s8 = int_to_ptr.vmem [resolvable:$false] %s388_s8 }
  0x19   : > { %p386_p12 = pnand %p384_p11, %p372_p10  ;;  %s390_s9 = scalar_lea.vmem %s389_s8, 1024 }
  0x1a   : > { %p391_p0 = scmp.lt.s32.totalorder %s130_s3, %s389_s8  ;;  %p392_p1 = scmp.lt.s32.totalorder %s390_s9, %s383_s6 }
  0x1b   : > { %p387_p13 = pneg %p386_p12 }
  0x1c   : > { %p393_p2 = por %p392_p1, %p391_p0 }
  0x1e   : > { %p394_p3 = pnand %p393_p2, %p387_p13 }
  0x20   : > { %397 = shalt.err (!%p394_p3)
}
  0x21   : > { %s482_s10 = smov 128   ;;  %s483_s11 = smov 8  }
  0x22   : > { %304 = dma.hbm_to_vmem [thread:$0]  (!%p565_p9), %s128_s29, 512, %s130_s3, %s116_s5, %s482_s10, %s482_s10, %s483_s11  }
  0x23   : > { %p286_p4 = scmp.ge.s32.totalorder %s478_s17, 1  ;;  %p137_p5 = scmp.lt.s32.totalorder %s478_s17, 4 }
  0x25   : > { %p138_p6 = pnand %p286_p4, %p137_p5 }
  0x26   : > { %s143_s12 = sand.u32 (!%p138_p6), 1, %s462_s13  }
  0x27   : > { %141 = sbr.rel (%p138_p6) target bundleno = 84 (0x54), region = 24  ;;  %s287_s19 = sshll.u32 (!%p138_p6), %s143_s12, 5 }
  0x28   : > { %s144_s20 = scalar_lea.sflag (!%p138_p6), [#allocation5], %s143_s12  ;;  %s147_s21 = scalar_lea.vmem (!%p138_p6), [#allocation4], %s287_s19 }
  0x2c   : > { %449 = dma.done.wait (%p550_p7), %s144_s20, 512  }
  0x2d   : > { %451 = vsyncadd (%p550_p7), %s144_s20, 4294966784  ;;  %s163_s24 = sld [smem:[#allocation3 + %s470_s15]]  ;;  %v164_v0 = vld [vmem:[%s147_s21] sm:$0xff]  ;;  %v165_v1 = vld [vmem:[%s147_s21 + $0x8] sm:$0xff]  ;;  %p288_p8 = scmp.ne.s32.totalorder %s470_s15, 0 }
  0x2e   : > { %v166_v2 = vld [vmem:[%s147_s21 + $0x10] sm:$0xff]  ;;  %v167_v4 = vld [vmem:[%s147_s21 + $0x18] sm:$0xff] }
  0x30   : > { %176 = sbr.rel (%p288_p8) target bundleno = 56 (0x38), region = 32 }
  0x33   : > { %v168_v3 = vstv %s163_s24 }
  0x34   : > { %v169_v5 = vmul.f32 %v168_v3, %v164_v0  ;;  %v170_v6 = vmul.f32 %v168_v3, %v165_v1  ;;  %v171_v7 = vmul.f32 %v168_v3, %v166_v2  ;;  %v172_v8 = vmul.f32 %v168_v3, %v167_v4 }
  0x36   : > { %177 = vst [vmem:[#allocation7] sm:$0xff] %v169_v5  ;;  %178 = vst [vmem:[#allocation7 + $0x8] sm:$0xff] %v170_v6 }
  0x37   : > { %179 = vst [vmem:[#allocation7 + $0x10] sm:$0xff] %v171_v7  ;;  %180 = vst [vmem:[#allocation7 + $0x18] sm:$0xff] %v172_v8 }
  0x38 PF: > { %p289_p7 = scmp.eq.s32.totalorder %s470_s15, 0 }
  0x3a   : > { %184 = sbr.rel (%p289_p7) target bundleno = 68 (0x44), region = 36 }
  0x3f   : > { %v185_v9 = vld [vmem:[#allocation7] sm:$0xff]  ;;  %v186_v10 = vld [vmem:[#allocation7 + $0x8] sm:$0xff]  ;;  %v187_v11 = vld [vmem:[#allocation7 + $0x10] sm:$0xff] }
  0x40   : > { %v189_v12 = vadd.f32 %v185_v9, %v169_v5  ;;  %v190_v13 = vadd.f32 %v186_v10, %v170_v6  ;;  %v191_v14 = vadd.f32 %v187_v11, %v171_v7  ;;  %v188_v15 = vld [vmem:[#allocation7 + $0x18] sm:$0xff] }
  0x41   : > { %v192_v16 = vadd.f32 %v188_v15, %v172_v8 }
  0x42   : > { %193 = vst [vmem:[#allocation7] sm:$0xff] %v189_v12  ;;  %194 = vst [vmem:[#allocation7 + $0x8] sm:$0xff] %v190_v13 }
  0x43   : > { %195 = vst [vmem:[#allocation7 + $0x10] sm:$0xff] %v191_v14  ;;  %196 = vst [vmem:[#allocation7 + $0x18] sm:$0xff] %v192_v16 }
  0x44 PF: > { %p585_p9 = scmp.eq.s32.totalorder %s280_s0, 2  ;;  %s484_s15 = smov [#allocation7]  }
  0x45   : > { %s207_s25 = sshll.u32 %s484_s15, 4  ;;  %s208_s25 = int_to_ptr.vmem [resolvable:$true] %s207_s25 }
  0x46   : > { %s398_s26 = scalar_lea.vmem %s208_s25, 512  ;;  %p405_p13 = scmp.lt.s32.totalorder %s208_s25, %s208_s25 }
  0x47   : > { %p399_p10 = scmp.ne.s32.totalorder %s208_s25, %s398_s26  ;;  %p406_p0 = scmp.lt.s32.totalorder %s398_s26, %s398_s26 }
  0x49   : > { %p400_p11 = pnand %p399_p10, %p585_p9  ;;  %p407_p1 = por %p406_p0, %p405_p13 }
  0x4b   : > { %p401_p12 = pneg %p400_p11 }
  0x4d   : > { %p408_p2 = pnand %p407_p1, %p401_p12 }
  0x4f   : > { %411 = shalt.err (!%p408_p2)
}
  0x50   : > { %s485_s27 = smov 128   ;;  %s486_s0 = smov 8  }
  0x51   : > { %298 = dma.vmem_to_hbm [thread:$0]  (%p585_p9), %s208_s25, 512, %s620_s2, [#allocation6], %s485_s27, %s485_s27, %s486_s0  }
  0x52   : > { %453 = dma.done.wait (%p585_p9), [#allocation6], 512  }
  0x53   : > { %455 = vsyncadd (%p585_p9), [#allocation6], 4294966784 }
  0x54 PF: > { %s20_s17 = sadd.s32 1, %s478_s17   ;;  %s625_s12 = smov %s462_s13 }
  0x55   : > { %p17_p3 = scmp.ge.s32.totalorder %s20_s17, 5   ;;  %s626_s13 = smov %s466_s14 }
  0x56   : > { %s627_s14 = smov %s556_s23  ;;  %s628_s15 = smov %s474_s16 }
  0x57   : > { %s629_s16 = smov %s631_s18  ;;  %19 = sbr.rel (!%p17_p3) target bundleno = 10 (0xa), region = 70 }
  0x5c   :  { %223 = vsyncpa [#allocation5], 1 }
  0x5d   :  { %225 = vsyncpa [#allocation5 + $0x1], 1 }
  0x5e   :  { %226 = vsyncpa [#allocation6], 1 }
  0x5f   :  { %228 = vsyncpa [#allocation6 + $0x1], 1 }

</bundles_post_ra>
